<compile_context>
chip_gen: v5e
topology: v5e:2x2
jax: 0.10.0
libtpu: 0.0.40
codegen_flags: <defaults>
</compile_context>

<pallas_src>
import functools

import jax
import jax.numpy as jnp
from jax.experimental import pallas as pl
from jax.experimental.pallas import tpu as pltpu

EPS = 1e-3
LANES = 128
MAX_TM = 2048   # rows per grid step; 2048*128*4B = 1 MiB per f32 input buffer
NCORES = 2      # v7x has 2 TensorCores; the extra grid slot is harmless elsewhere


def _charbonnier_kernel(x_ref, y_ref, o_ref, *, eps):
    # o_ref is a per-core (TM, LANES) f32 partial-sum block that stays resident
    # in VMEM across the inner ("arbitrary") reduction axis.
    @pl.when(pl.program_id(1) == 0)
    def _():
        o_ref[...] = jnp.zeros_like(o_ref)

    x = x_ref[...].astype(jnp.float32)
    y = y_ref[...].astype(jnp.float32)
    d = x - y
    o_ref[...] += jnp.sqrt(d * d + jnp.float32(eps * eps))


def charbonnier_loss(x, y, eps=EPS):
    assert x.shape == y.shape, (x.shape, y.shape)
    n_total = int(x.size)

    xf = x.reshape(-1)
    yf = y.reshape(-1)

    rows_full = n_total // LANES
    tm = min(MAX_TM, (rows_full // 8) * 8)      # sublane-aligned tile height

    bulk_sum = jnp.float32(0.0)
    n_bulk = 0
    if tm >= 8:
        n_tiles = rows_full // tm                # whole (tm, 128) tiles
        nc = NCORES if n_tiles >= NCORES else 1  # cores we can actually use
        n_tiles = (n_tiles // nc) * nc           # even split across cores
        inner = n_tiles // nc                    # reduction steps per core
        n_bulk = n_tiles * tm * LANES

        if n_bulk > 0:
            # In the common (aligned) case these are free reshapes, no copies.
            xb = xf if n_bulk == n_total else xf[:n_bulk]
            yb = yf if n_bulk == n_total else yf[:n_bulk]
            x2d = xb.reshape(n_tiles * tm, LANES)
            y2d = yb.reshape(n_tiles * tm, LANES)

            kernel = functools.partial(_charbonnier_kernel, eps=eps)
            partials = pl.pallas_call(
                kernel,
                out_shape=jax.ShapeDtypeStruct((nc * tm, LANES), jnp.float32),
                grid_spec=pltpu.PrefetchScalarGridSpec(
                    num_scalar_prefetch=0,
                    grid=(nc, inner),
                    in_specs=[
                        pl.BlockSpec((tm, LANES), lambda c, i: (c * inner + i, 0)),
                        pl.BlockSpec((tm, LANES), lambda c, i: (c * inner + i, 0)),
                    ],
                    out_specs=pl.BlockSpec((tm, LANES), lambda c, i: (c, 0)),
                ),
                compiler_params=pltpu.CompilerParams(
                    dimension_semantics=("parallel", "arbitrary"),
                ),
            )(x2d, y2d)
            bulk_sum = jnp.sum(partials)

    # Tail (sub-tile remainder): handled in plain JAX so the kernel never needs
    # padding or per-step masking.
    if n_bulk < n_total:
        xt = xf[n_bulk:].astype(jnp.float32)
        yt = yf[n_bulk:].astype(jnp.float32)
        dt = xt - yt
        tail_sum = jnp.sum(jnp.sqrt(dt * dt + jnp.float32(eps * eps)))
    else:
        tail_sum = jnp.float32(0.0)

    return (bulk_sum + tail_sum) / jnp.float32(n_total)


if __name__ == "__main__":
    key = jax.random.PRNGKey(0)
    kx, ky = jax.random.split(key)
    # NCHW inputs, as the PyTorch module would receive.
    x = jax.random.normal(kx, (2, 4, 16, 16), dtype=jnp.float32)
    y = jax.random.normal(ky, (2, 4, 16, 16), dtype=jnp.float32)

    loss = charbonnier_loss(x, y)
    jax.block_until_ready(loss)

    # Reference check in plain JAX.
    diff = x - y
    ref = jnp.mean(jnp.sqrt(diff * diff + EPS * EPS))
    assert jnp.allclose(loss, ref, rtol=1e-5, atol=1e-6), (loss, ref)

    print("KERNEL_OK")
</pallas_src>

<mosaic_0001>
module attributes {stable_mosaic.version = 11 : i64} {
  func.func @_charbonnier_kernel(%arg0: i32, %arg1: i32, %arg2: memref<16x128xf32, #tpu.memory_space<vmem>>, %arg3: memref<16x128xf32, #tpu.memory_space<vmem>>, %arg4: memref<16x128xf32, #tpu.memory_space<vmem>>) attributes {dimension_semantics = [#tpu.dimension_semantics<parallel>, #tpu.dimension_semantics<arbitrary>], iteration_bounds = array<i64: 1, 1>, scalar_prefetch = 0 : i64, scratch_operands = 0 : i64, tpu.core_type = #tpu.core_type<tc>, window_params = [{transform_indices = @transform_0, window_bounds = array<i64: 16, 128>}, {transform_indices = @transform_1, window_bounds = array<i64: 16, 128>}, {transform_indices = @transform_2, window_bounds = array<i64: 16, 128>}]} {
    %c0_i32 = arith.constant 0 : i32
    %0 = arith.cmpi eq, %arg1, %c0_i32 : i32
    %1 = arith.extui %0 : i1 to i32
    %c0_i32_0 = arith.constant 0 : i32
    %2 = arith.cmpi ne, %1, %c0_i32_0 : i32
    scf.if %2 {
      %cst_8 = arith.constant 0.000000e+00 : f32
      %13 = vector.broadcast %cst_8 : f32 to vector<16x128xf32>
      %c0_9 = arith.constant 0 : index
      %c0_10 = arith.constant 0 : index
      %14 = vector.load %arg4[%c0_9, %c0_10] : memref<16x128xf32, #tpu.memory_space<vmem>>, vector<16x128xf32>
      tpu.vector_store %arg4[%c0_9, %c0_10], %13 {strides = array<i32>} : memref<16x128xf32, #tpu.memory_space<vmem>>, vector<16x128xf32>,
    } else {
    }
    %c0 = arith.constant 0 : index
    %c0_1 = arith.constant 0 : index
    %3 = vector.load %arg2[%c0, %c0_1] : memref<16x128xf32, #tpu.memory_space<vmem>>, vector<16x128xf32>
    %c0_2 = arith.constant 0 : index
    %c0_3 = arith.constant 0 : index
    %4 = vector.load %arg3[%c0_2, %c0_3] : memref<16x128xf32, #tpu.memory_space<vmem>>, vector<16x128xf32>
    %5 = arith.subf %3, %4 : vector<16x128xf32>
    %c0_4 = arith.constant 0 : index
    %c0_5 = arith.constant 0 : index
    %6 = vector.load %arg4[%c0_4, %c0_5] : memref<16x128xf32, #tpu.memory_space<vmem>>, vector<16x128xf32>
    %7 = arith.mulf %5, %5 : vector<16x128xf32>
    %cst = arith.constant 9.99999997E-7 : f32
    %8 = vector.broadcast %cst : f32 to vector<16x128xf32>
    %9 = arith.addf %7, %8 : vector<16x128xf32>
    %10 = math.sqrt %9 : vector<16x128xf32>
    %11 = arith.addf %6, %10 : vector<16x128xf32>
    %c0_6 = arith.constant 0 : index
    %c0_7 = arith.constant 0 : index
    %12 = vector.load %arg4[%c0_6, %c0_7] : memref<16x128xf32, #tpu.memory_space<vmem>>, vector<16x128xf32>
    tpu.vector_store %arg4[%c0_6, %c0_7], %11 {strides = array<i32>} : memref<16x128xf32, #tpu.memory_space<vmem>>, vector<16x128xf32>,
    return
  }
  func.func @transform_0(%arg0: i32, %arg1: i32) -> (i32, i32) {
    %c1_i32 = arith.constant 1 : i32
    %0 = arith.muli %arg0, %c1_i32 : i32
    %1 = arith.addi %0, %arg1 : i32
    %c0_i32 = arith.constant 0 : i32
    %c0_i32_0 = arith.constant 0 : i32
    return %1, %c0_i32 : i32, i32
  }
  func.func @transform_1(%arg0: i32, %arg1: i32) -> (i32, i32) {
    %c1_i32 = arith.constant 1 : i32
    %0 = arith.muli %arg0, %c1_i32 : i32
    %1 = arith.addi %0, %arg1 : i32
    %c0_i32 = arith.constant 0 : i32
    %c0_i32_0 = arith.constant 0 : i32
    return %1, %c0_i32 : i32, i32
  }
  func.func @transform_2(%arg0: i32, %arg1: i32) -> (i32, i32) {
    %c0_i32 = arith.constant 0 : i32
    %c0_i32_0 = arith.constant 0 : i32
    return %arg0, %c0_i32 : i32, i32
  }
}

</mosaic_0001>

<bundles_post_ra>
// kernel: tpu_custom_call.1
= control target key start
LH: loop header
LB: loop body
LE: loop exit
PB: predicated region body
PF: predicated region fallthrough
CT: control target
= control target key end

     0   :  { %7 = vsyncpa [#allocation3], 0  ;;  %s248_s0 = inlined_call_operand.hbm [shape: f32[16,128], index: 0, kind: input, shape index: {}]   ;;  %s249_s1 = inlined_call_operand.hbm [shape: f32[16,128], index: 1, kind: input, shape index: {}]   ;;  %s250_s2 = inlined_call_operand.hbm [shape: f32[16,128], index: 2, kind: output, shape index: {}]  }
   0x1   :  { %8 = vsyncpa [#allocation6], 0 }
   0x2   :  { %9 = vsyncpa [#allocation4], 0  ;;  %s18_s11 = sshll.u32 %s248_s0, 4  ;;  %s210_s12 = smov [#allocation2]   ;;  %s19_s11 = int_to_ptr.hbm [resolvable:$true] %s18_s11 }
   0x3   :  { %s20_s13 = sshll.u32 %s210_s12, 4  ;;  %s35_s16 = sshll.u32 %s249_s1, 4  ;;  %s21_s13 = int_to_ptr.vmem [resolvable:$true] %s20_s13  ;;  %s36_s16 = int_to_ptr.hbm [resolvable:$true] %s35_s16 }
   0x4   :  { %s211_s17 = smov 128   ;;  %s212_s18 = smov 8  }
   0x5   :  { %26 = dma.hbm_to_vmem [thread:$0]  %s19_s11, 256, %s21_s13, [#allocation3], %s211_s17, %s211_s17, %s212_s18  }
   0x6   :  { %s213_s19 = smov [#allocation5]  }
   0x7   :  { %s37_s20 = sshll.u32 %s213_s19, 4  ;;  %s38_s20 = int_to_ptr.vmem [resolvable:$true] %s37_s20 }
   0x8   :  { %43 = dma.hbm_to_vmem [thread:$0]  %s36_s16, 256, %s38_s20, [#allocation6], %s211_s17, %s211_s17, %s212_s18  }
   0x9   :  { %204 = dma.done.wait [#allocation3], 256  }
   0xa   :  { %205 = vsyncadd [#allocation3], 4294967040 }
   0xb   :  { %206 = dma.done.wait [#allocation6], 256  }
   0xc   :  { %207 = vsyncadd [#allocation6], 4294967040  ;;  %v62_v0 = vld [vmem:[#allocation2] sm:$0xff]  ;;  %v64_v1 = vld [vmem:[#allocation5] sm:$0xff]  ;;  %s214_s0 = smov [#allocation7]   ;;  %s108_s23 = sshll.u32 %s250_s2, 4  ;;  %s109_s23 = int_to_ptr.hbm [resolvable:$true] %s108_s23 }
   0xd   :  { %v63_v2 = vld [vmem:[#allocation2 + $0x8] sm:$0xff]  ;;  %v66_v3 = vsub.f32 %v62_v0, %v64_v1  ;;  %v65_v4 = vld [vmem:[#allocation5 + $0x8] sm:$0xff]  ;;  %s106_s1 = sshll.u32 %s214_s0, 4  ;;  %s107_s1 = int_to_ptr.vmem [resolvable:$true] %s106_s1 }
   0xe   :  { %v67_v5 = vsub.f32 %v63_v2, %v65_v4 }
   0xf   :  { %v70_v6 = vmul.f32 %v66_v3, %v66_v3 }
  0x10   :  { %v71_v7 = vmul.f32 %v67_v5, %v67_v5 }
  0x11   :  { %v72_v8 = vadd.f32 1e-06, %v70_v6 }
  0x12   :  { %v73_v9 = vadd.f32 1e-06, %v71_v7 }
  0x13   :  { %128 = vrsqrt.f32 %v72_v8  ;;  %vm81_vm0 = vcmp.eq.f32.partialorder %v72_v8, inf  ;;  %v84_v21 = vand.u32 2147483648, %v72_v8  ;;  %vm83_vm1 = vcmp.eq.f32.partialorder %v72_v8, 0.0 }
  0x14   :  { %130 = vrsqrt.f32 %v73_v9  ;;  %vm93_vm2 = vcmp.eq.f32.partialorder %v73_v9, inf  ;;  %v96_v24 = vand.u32 2147483648, %v73_v9  ;;  %vm95_vm3 = vcmp.eq.f32.partialorder %v73_v9, 0.0 }
  0x19   :  { %v129_v10 = vpop.eup %128 }
  0x1a   :  { %v131_v11 = vpop.eup %130  ;;  %v75_v12 = vmul.f32 %v129_v10, %v72_v8 }
  0x1b   :  { %v87_v13 = vmul.f32 %v131_v11, %v73_v9 }
  0x1c   :  { %v76_v14 = vmul.f32 %v129_v10, %v75_v12 }
  0x1d   :  { %v88_v15 = vmul.f32 %v131_v11, %v87_v13 }
  0x1e   :  { %v77_v16 = vmul.f32 0.5, %v76_v14 }
  0x1f   :  { %v89_v17 = vmul.f32 0.5, %v88_v15 }
  0x20   :  { %v78_v18 = vsub.f32 1.5, %v77_v16 }
  0x21   :  { %v90_v19 = vsub.f32 1.5, %v89_v17 }
  0x22   :  { %v79_v20 = vmul.f32 %v129_v10, %v78_v18 }
  0x23   :  { %v91_v22 = vmul.f32 %v131_v11, %v90_v19 }
  0x24   :  { %v80_v23 = vmul.f32 %v79_v20, %v72_v8 }
  0x25   :  { %v92_v25 = vmul.f32 %v91_v22, %v73_v9 }
  0x26   :  { %v82_v26 = vsel %vm81_vm0, %v72_v8, %v80_v23 }
  0x27   :  { %v85_v27 = vsel %vm83_vm1, %v84_v21, %v82_v26  ;;  %v94_v28 = vsel %vm93_vm2, %v73_v9, %v92_v25 }
  0x28   :  { %v97_v29 = vsel %vm95_vm3, %v96_v24, %v94_v28  ;;  %100 = vst [vmem:[#allocation7] sm:$0xff] %v85_v27 }
  0x29   :  { %101 = vst [vmem:[#allocation7 + $0x8] sm:$0xff] %v97_v29 }
  0x2a   :  { %114 = dma.vmem_to_hbm [thread:$0]  %s107_s1, 256, %s109_s23, [#allocation4], %s211_s17, %s211_s17, %s212_s18  }
  0x2b   :  { %208 = dma.done.wait [#allocation4], 256  }
  0x2c   :  { %209 = vsyncadd [#allocation4], 4294967040 }
  0x2d   :  { %119 = vsyncpa [#allocation3], 1 }
  0x2e   :  { %120 = vsyncpa [#allocation6], 1 }
  0x2f   :  { %121 = vsyncpa [#allocation4], 1 }

</bundles_post_ra>
